<compile_context>
chip_gen: v7x
topology: tpu7x:2x2x1
jax: 0.10.0
libtpu: 0.0.40
codegen_flags: <defaults>
</compile_context>

<pallas_src>
import functools

import jax
import jax.numpy as jnp
from jax.experimental import pallas as pl
from jax.experimental.pallas import tpu as pltpu

_LANE = 128      # lane width: last-dim tiling quantum
_SUBLANE = 8     # sublane quantum for the second-to-last dim


def _round_up(n, m):
    return ((n + m - 1) // m) * m


def _pad2d(x, rows, cols):
    return jnp.pad(x, ((0, rows - x.shape[0]), (0, cols - x.shape[1])))


def _vmem_capacity_bytes():
    """Per-TensorCore VMEM capacity (v5e/v6e: 128 MiB, v7x: 64 MiB)."""
    try:
        info = pltpu.get_tpu_info()
        cap = getattr(info, "vmem_capacity_bytes", None)
        if cap is not None and int(cap) > 0:
            return int(cap)
    except Exception:
        pass
    return 64 << 20   # conservative fallback (v7x physical per-TC)


def _choose_block_m(batch, requested):
    """Pick the batch tile: as large as requested, but keep >=2 grid steps
    (so v7x's second TensorCore gets work) and 16-row alignment for bf16."""
    batch8 = _round_up(max(int(batch), 1), _SUBLANE)
    bm = max(_SUBLANE, min(_round_up(int(requested), _SUBLANE), batch8))
    if batch8 // bm < 2 and batch8 >= 2 * _SUBLANE:
        bm = _round_up(batch8 // 2, _SUBLANE)
    if bm >= 16:
        bm = _round_up(bm, 16)
    return bm


def _build_layers(params, fold_first=True):
    """Build [(W_f32, b_f32, relu_after), ...] matching Decoder.forward.

    params: list of (W, b) with W shaped (in, out), b shaped (1, out) or (out,).
    Order: project_from_latent, MLP linears..., Yhat.

    project_from_latent has no activation, so when there is at least one MLP
    linear we fold it into that linear (W01 = W0 @ W1, b01 = b0 @ W1 + b1);
    the folded layer is then followed by ReLU, exactly like the original chain.
    """
    def as_row(b):
        return jnp.asarray(b, jnp.float32).reshape(1, -1)

    if fold_first and len(params) >= 3:
        (w0, b0), (w1, b1) = params[0], params[1]
        w0 = jnp.asarray(w0, jnp.float32)
        w1 = jnp.asarray(w1, jnp.float32)
        layers = [(w0 @ w1, as_row(b0) @ w1 + as_row(b1), True)]
        mid = params[2:-1]
    else:
        layers = [(jnp.asarray(params[0][0], jnp.float32), as_row(params[0][1]), False)]
        mid = params[1:-1]
    layers += [(jnp.asarray(w, jnp.float32), as_row(b), True) for (w, b) in mid]
    wy, by = params[-1]
    layers.append((jnp.asarray(wy, jnp.float32), as_row(by), False))
    return layers


def _decoder_kernel(relu_flags, z_ref, *refs):
    """One batch tile of the fused MLP.

    refs = [w0, b0, w1, b1, ..., out].  Weights are (in_pad, out_pad) bf16,
    biases are (1, out_pad) f32, z is (block_m, latent) bf16.  Matmuls
    accumulate in f32 on the MXU; bias-add / ReLU run in f32 on the VPU.
    """
    out_ref = refs[-1]
    param_refs = refs[:-1]

    h = z_ref[...]
    for li, relu in enumerate(relu_flags):
        w = param_refs[2 * li][...]
        b = param_refs[2 * li + 1][...]
        if h.dtype != w.dtype:
            h = h.astype(w.dtype)
        h = jnp.dot(h, w, preferred_element_type=jnp.float32)
        h = h + b.astype(jnp.float32)
        if relu:
            h = jnp.maximum(h, 0.0)
    out_ref[...] = h.astype(out_ref.dtype)


def make_decoder_forward(params, *, block_m=512, fold_first=True,
                         weight_dtype=jnp.bfloat16):
    """One-time prep (fold + pad + bf16 cast) -> jitted forward closure.

    params: [(W, b), ...] with W (in, out), b (1, out) or (out,);
            order = project_from_latent, MLP linears..., Yhat.
    Returned fn: z (batch, latent_dim) f32/bf16 -> Yhat (batch, output_dim) f32.
    """
    layers = _build_layers(params, fold_first=fold_first)
    relu_flags = tuple(bool(r) for (_, _, r) in layers)
    true_in = [int(w.shape[0]) for (w, _, _) in layers]
    true_out = [int(w.shape[1]) for (w, _, _) in layers]
    latent_dim = true_in[0]
    out_dim = true_out[-1]

    # Lane padding: layer 0's K stays equal to the tiny latent dim (z is not
    # lane-padded); every output dim (and hence every subsequent input dim)
    # is padded to a multiple of 128 for lane-dense MXU columns / stores.
    out_pads = [_round_up(n, _LANE) for n in true_out]
    in_pads = [latent_dim] + out_pads[:-1]

    # One-time parameter prep (hoisted out of the hot path).
    flat_params = []
    for li, (w, b, _) in enumerate(layers):
        w_p = _pad2d(w, in_pads[li], out_pads[li]).astype(weight_dtype)
        b_p = _pad2d(b, 1, out_pads[li]).astype(jnp.float32)
        flat_params += [w_p, b_p]
    flat_params = tuple(flat_params)

    w_itemsize = jnp.dtype(weight_dtype).itemsize
    param_bytes = sum(int(a.size) * a.dtype.itemsize for a in flat_params)
    true_param_bytes = sum(ti * to * w_itemsize + to * 4
                           for ti, to in zip(true_in, true_out))
    out_pad = out_pads[-1]
    max_feat = max(out_pads)

    vmem_cap = _vmem_capacity_bytes()
    vmem_budget = int(0.8 * vmem_cap)   # leave headroom for compiler scratch

    kernel = functools.partial(_decoder_kernel, relu_flags)

    def fwd_impl(z):
        batch = int(z.shape[0])
        bm = _choose_block_m(batch, block_m)
        batch_pad = _round_up(batch, bm)
        grid = (batch_pad // bm,)

        # Only batch padding; latent (lane) dim stays at its true width.
        z_p = _pad2d(z.astype(weight_dtype), batch_pad, latent_dim)

        in_specs = [pl.BlockSpec((bm, latent_dim), lambda i: (i, 0))]
        for li in range(len(relu_flags)):
            w_p = flat_params[2 * li]
            b_p = flat_params[2 * li + 1]
            # Constant block index -> params stay resident across grid steps.
            in_specs.append(pl.BlockSpec(w_p.shape, lambda i: (0, 0)))
            in_specs.append(pl.BlockSpec(b_p.shape, lambda i: (0, 0)))
        out_specs = pl.BlockSpec((bm, out_pad), lambda i: (i, 0))

        # VMEM residency budget: params (double-buffered by default pipeline),
        # double-buffered z / out tiles, plus f32 activation intermediates.
        tile_bytes = 2 * bm * latent_dim * w_itemsize + 2 * bm * out_pad * 4
        act_bytes = 4 * bm * max_feat * 4
        resident = 2 * param_bytes + tile_bytes + act_bytes
        if resident > vmem_budget:
            # TODO(synk): weight-streaming fallback (tile the widest layer over
            # its output-feature dim with an accumulator) for configs whose
            # resident params exceed v7x's 64 MiB VMEM.
            raise ValueError(
                f"Decoder params + tiles need ~{resident} B of VMEM but only "
                f"{vmem_budget} B are budgeted on this TPU generation; reduce "
                "block_m / hidden_dims or add a weight-streaming variant.")
        vmem_limit = int(min(vmem_budget, max(2 * resident, 16 << 20)))

        # Advisory cost from the TRUE (unpadded) dims.
        flops = 2 * batch * sum(ti * to for ti, to in zip(true_in, true_out))
        bytes_accessed = (batch * latent_dim * w_itemsize
                          + true_param_bytes + batch * out_dim * 4)
        cost = pl.CostEstimate(flops=int(flops), transcendentals=0,
                               bytes_accessed=int(bytes_accessed))

        out_p = pl.pallas_call(
            kernel,
            out_shape=jax.ShapeDtypeStruct((batch_pad, out_pad), jnp.float32),
            grid=grid,
            in_specs=in_specs,
            out_specs=out_specs,
            compiler_params=pltpu.CompilerParams(
                dimension_semantics=("parallel",),
                vmem_limit_bytes=vmem_limit),
            cost_estimate=cost,
        )(z_p, *flat_params)

        return out_p[:batch, :out_dim]

    return jax.jit(fwd_impl)


def decoder_forward(z, params, *, block_m=512, fold_first=True,
                    weight_dtype=jnp.bfloat16):
    """Convenience one-shot wrapper (prefer make_decoder_forward for reuse)."""
    return make_decoder_forward(params, block_m=block_m, fold_first=fold_first,
                                weight_dtype=weight_dtype)(z)


def init_linear_params(key, in_dim, out_dim):
    """Deterministic init mimicking torch.nn.Linear default (uniform +-1/sqrt(fan_in))."""
    kw, kb = jax.random.split(key)
    bound = 1.0 / (in_dim ** 0.5)
    w = jax.random.uniform(kw, (in_dim, out_dim), jnp.float32, -bound, bound)
    b = jax.random.uniform(kb, (1, out_dim), jnp.float32, -bound, bound)
    return w, b


def decoder_reference(z, params):
    """Pure-JAX f32 reference with the exact PyTorch module semantics."""
    (w0, b0) = params[0]
    h = z @ w0 + b0
    for (w, b) in params[1:-1]:
        h = jnp.maximum(h @ w + b, 0.0)
    (wy, by) = params[-1]
    return h @ wy + by


def decoder_reference_kernel_numerics(z, params, *, fold_first=True,
                                      weight_dtype=jnp.bfloat16):
    """Reference mirroring the kernel's numerics (fold + bf16 operands,
    f32 accumulation) for a tight correctness check."""
    h = z.astype(jnp.float32)
    for (w, b, relu) in _build_layers(params, fold_first=fold_first):
        wq = w.astype(weight_dtype)
        h = jnp.dot(h.astype(weight_dtype), wq,
                    preferred_element_type=jnp.float32) + b
        if relu:
            h = jnp.maximum(h, 0.0)
    return h


if __name__ == "__main__":
    latent_dim = 8
    hidden_dims = [32, 32]
    output_dim = 16
    batch = 256          # exercises the batch-tiled grid (>=2 parallel steps)

    root = jax.random.PRNGKey(0)
    keys = jax.random.split(root, len(hidden_dims) + 2)

    # Parameters: project_from_latent, MLP linears, Yhat.
    params = [init_linear_params(keys[0], latent_dim, hidden_dims[0])]
    for i in range(1, len(hidden_dims)):
        params.append(init_linear_params(keys[i], hidden_dims[i - 1], hidden_dims[i]))
    params.append(init_linear_params(keys[len(hidden_dims)], hidden_dims[-1], output_dim))

    # Input batch dict (mirrors the PyTorch module's interface).
    z = jax.random.normal(keys[-1], (batch, latent_dim), jnp.float32)
    batch_dict = {"z": z}

    # One-time prep (fold/pad/cast) + jitted forward; then the hot-path call.
    decoder = make_decoder_forward(params, block_m=512)
    yhat = jax.block_until_ready(decoder(batch_dict["z"]))
    batch_dict["Yhat"] = yhat

    assert yhat.shape == (batch, output_dim)

    # Tight check vs. a reference with identical numerics (fold + bf16 + f32 acc).
    ref_q = decoder_reference_kernel_numerics(z, params)
    assert jnp.allclose(yhat, ref_q, atol=2e-3, rtol=2e-3), "mismatch vs kernel-numerics reference"

    # Semantic check vs. the full-precision reference (bf16 weight-quantization tolerance).
    ref_f32 = decoder_reference(z, params)
    assert jnp.allclose(yhat, ref_f32, atol=5e-2, rtol=5e-2), "mismatch vs f32 reference"

    print("KERNEL_OK")
</pallas_src>

<mosaic_0001>
module attributes {stable_mosaic.version = 11 : i64} {
  func.func @_decoder_kernel(%arg0: i32, %arg1: memref<128x8xbf16, #tpu.memory_space<vmem>>, %arg2: memref<8x128xbf16, #tpu.memory_space<vmem>>, %arg3: memref<1x128xf32, #tpu.memory_space<vmem>>, %arg4: memref<128x128xbf16, #tpu.memory_space<vmem>>, %arg5: memref<1x128xf32, #tpu.memory_space<vmem>>, %arg6: memref<128x128xf32, #tpu.memory_space<vmem>>) attributes {dimension_semantics = [#tpu.dimension_semantics<parallel>], iteration_bounds = array<i64: 2>, scalar_prefetch = 0 : i64, scratch_operands = 0 : i64, tpu.core_type = #tpu.core_type<tc>, window_params = [{transform_indices = @transform_0, window_bounds = array<i64: 128, 8>}, {pipeline_mode = #tpu.pipeline_mode<synchronous>, transform_indices = @transform_1, window_bounds = array<i64: 8, 128>}, {pipeline_mode = #tpu.pipeline_mode<synchronous>, transform_indices = @transform_2, window_bounds = array<i64: 1, 128>}, {pipeline_mode = #tpu.pipeline_mode<synchronous>, transform_indices = @transform_3, window_bounds = array<i64: 128, 128>}, {pipeline_mode = #tpu.pipeline_mode<synchronous>, transform_indices = @transform_4, window_bounds = array<i64: 1, 128>}, {transform_indices = @transform_5, window_bounds = array<i64: 128, 128>}]} {
    %c0 = arith.constant 0 : index
    %c0_0 = arith.constant 0 : index
    %0 = vector.load %arg1[%c0, %c0_0] : memref<128x8xbf16, #tpu.memory_space<vmem>>, vector<128x8xbf16>
    %c0_1 = arith.constant 0 : index
    %c0_2 = arith.constant 0 : index
    %1 = vector.load %arg2[%c0_1, %c0_2] : memref<8x128xbf16, #tpu.memory_space<vmem>>, vector<8x128xbf16>
    %c0_3 = arith.constant 0 : index
    %c0_4 = arith.constant 0 : index
    %2 = vector.load %arg3[%c0_3, %c0_4] : memref<1x128xf32, #tpu.memory_space<vmem>>, vector<1x128xf32>
    %cst = arith.constant dense<0.000000e+00> : vector<128x128xf32>
    %3 = tpu.matmul %0, %1, %cst {dimension_numbers = #tpu.dot_dimension_numbers<[1], [0], [0], [1], [0, 0, 1, 1], [], []>} : vector<128x8xbf16>, vector<8x128xbf16>, vector<128x128xf32> -> vector<128x128xf32>
    %4 = vector.broadcast %2 : vector<1x128xf32> to vector<128x128xf32>
    %5 = arith.addf %3, %4 : vector<128x128xf32>
    %cst_5 = arith.constant 0.000000e+00 : f32
    %6 = vector.broadcast %cst_5 : f32 to vector<128x128xf32>
    %7 = arith.maximumf %5, %6 : vector<128x128xf32>
    %c0_6 = arith.constant 0 : index
    %c0_7 = arith.constant 0 : index
    %8 = vector.load %arg4[%c0_6, %c0_7] : memref<128x128xbf16, #tpu.memory_space<vmem>>, vector<128x128xbf16>
    %c0_8 = arith.constant 0 : index
    %c0_9 = arith.constant 0 : index
    %9 = vector.load %arg5[%c0_8, %c0_9] : memref<1x128xf32, #tpu.memory_space<vmem>>, vector<1x128xf32>
    %10 = arith.truncf %7 : vector<128x128xf32> to vector<128x128xbf16>
    %cst_10 = arith.constant dense<0.000000e+00> : vector<128x128xf32>
    %11 = tpu.matmul %10, %8, %cst_10 {dimension_numbers = #tpu.dot_dimension_numbers<[1], [0], [0], [1], [0, 0, 1, 1], [], []>} : vector<128x128xbf16>, vector<128x128xbf16>, vector<128x128xf32> -> vector<128x128xf32>
    %12 = vector.broadcast %9 : vector<1x128xf32> to vector<128x128xf32>
    %13 = arith.addf %11, %12 : vector<128x128xf32>
    %c0_11 = arith.constant 0 : index
    %c0_12 = arith.constant 0 : index
    %14 = vector.load %arg6[%c0_11, %c0_12] : memref<128x128xf32, #tpu.memory_space<vmem>>, vector<128x128xf32>
    tpu.vector_store %arg6[%c0_11, %c0_12], %13 {strides = array<i32>} : memref<128x128xf32, #tpu.memory_space<vmem>>, vector<128x128xf32>,
    return
  }
  func.func @transform_0(%arg0: i32) -> (i32, i32) {
    %c0_i32 = arith.constant 0 : i32
    %c0_i32_0 = arith.constant 0 : i32
    return %arg0, %c0_i32 : i32, i32
  }
  func.func @transform_1(%arg0: i32) -> (i32, i32) {
    %c0_i32 = arith.constant 0 : i32
    %c0_i32_0 = arith.constant 0 : i32
    %c0_i32_1 = arith.constant 0 : i32
    return %c0_i32, %c0_i32_0 : i32, i32
  }
  func.func @transform_2(%arg0: i32) -> (i32, i32) {
    %c0_i32 = arith.constant 0 : i32
    %c0_i32_0 = arith.constant 0 : i32
    %c0_i32_1 = arith.constant 0 : i32
    return %c0_i32, %c0_i32_0 : i32, i32
  }
  func.func @transform_3(%arg0: i32) -> (i32, i32) {
    %c0_i32 = arith.constant 0 : i32
    %c0_i32_0 = arith.constant 0 : i32
    %c0_i32_1 = arith.constant 0 : i32
    return %c0_i32, %c0_i32_0 : i32, i32
  }
  func.func @transform_4(%arg0: i32) -> (i32, i32) {
    %c0_i32 = arith.constant 0 : i32
    %c0_i32_0 = arith.constant 0 : i32
    %c0_i32_1 = arith.constant 0 : i32
    return %c0_i32, %c0_i32_0 : i32, i32
  }
  func.func @transform_5(%arg0: i32) -> (i32, i32) {
    %c0_i32 = arith.constant 0 : i32
    %c0_i32_0 = arith.constant 0 : i32
    return %arg0, %c0_i32 : i32, i32
  }
}

</mosaic_0001>

<bundles_post_ra>
// kernel: fwd_impl.1
= control target key start
LH: loop header
LB: loop body
LE: loop exit
PB: predicated region body
PF: predicated region fallthrough
CT: control target
= control target key end

     0   :  { %s874_s18 = smov 0   ;;  %s964_s0 = inlined_call_operand.vmem [shape: bf16[256,8], index: 0, kind: input, shape index: {}]   ;;  %s965_s1 = inlined_call_operand.vmem [shape: bf16[8,128], index: 1, kind: input, shape index: {}]   ;;  %s966_s2 = inlined_call_operand.vmem [shape: f32[1,128], index: 2, kind: input, shape index: {}]   ;;  %s967_s3 = inlined_call_operand.vmem [shape: bf16[128,128], index: 3, kind: input, shape index: {}]   ;;  %s968_s4 = inlined_call_operand.vmem [shape: f32[1,128], index: 4, kind: input, shape index: {}]   ;;  %s969_s5 = inlined_call_operand.vmem [shape: f32[256,128], index: 5, kind: output, shape index: {}]  }
   0x1 LB: > { %s683_s19 = sadd.s32 4294967295, %s842_s18   ;;  %p687_p0 = scmp.ge.s32.totalorder %s842_s18, 1  ;;  %s842_s18 = sphi %s874_s18, %s15_s18  }
   0x2   : > { %p188_p1 = scmp.lt.s32.totalorder %s842_s18, 3 }
   0x4   : > { %p189_p2 = pnand %p687_p0, %p188_p1 }
   0x5   : > { %v245_v0 = vld [vmem:[%s965_s1] sm:$0xf] (!%p189_p2)  ;;  %vm318_vm0 = vcmask (!%p189_p2), 1043456   ;;  %s688_s22 = sshll.u32 (!%p189_p2), %s683_s19, 4  ;;  %v829_v3 = vld [vmem:[%s967_s3 + $0x8] sm:$0xff] (!%p189_p2)   ;;  %vm293_vm1 = vcmask (!%p189_p2), 64512  }
   0x6   : > { %192 = sbr.rel (%p189_p2) target bundleno = 482 (0x1e2), region = 40  ;;  %v828_v1 = vld [vmem:[%s967_s3] sm:$0xff] (!%p189_p2)   ;;  %811 = vmatprep.subr.msk.bf16.mxu0 (!%p189_p2), %vm318_vm0, %v245_v0  ;;  %v320_v2 = vsel (!%p189_p2), %vm318_vm0, %v245_v0, 0  ;;  %p217_p3 = scmp.lt.s32.totalorder (!%p189_p2), %s688_s22, 31  ;;  %v830_v4 = vld [vmem:[%s967_s3 + $0x10] sm:$0xff] (!%p189_p2)   ;;  %v831_v8 = vld [vmem:[%s967_s3 + $0x18] sm:$0xff] (!%p189_p2)  }
   0x7   : > { %746 = vmatpush3.bf16.msra.mxu0 (!%p189_p2), %v320_v2  ;;  %795 = vmatprep.subr.bf16.mxu1 (!%p189_p2), %v828_v1  ;;  %v832_v10 = vld [vmem:[%s967_s3 + $0x20] sm:$0xff] (!%p189_p2)   ;;  %v833_v12 = vld [vmem:[%s967_s3 + $0x28] sm:$0xff] (!%p189_p2)   ;;  %v834_v16 = vld [vmem:[%s967_s3 + $0x30] sm:$0xff] (!%p189_p2)  }
   0x8   : > { %763 = vmatprep.subr.bf16.mxu0 (!%p189_p2), %v828_v1  ;;  %803 = vmatpush3.bf16.msra.mxu1 (!%p189_p2), %v828_v1  ;;  %v835_v17 = vld [vmem:[%s967_s3 + $0x38] sm:$0xff] (!%p189_p2)   ;;  %v692_v18 = vld [vmem:[%s966_s2] ss:$0 sm:$0xff] (!%p189_p2) }
   0x9   : > { %796 = vmatprep.subr.bf16.mxu1 (!%p189_p2), %v829_v3 }
   0xc   : > { %804 = vmatpush3.bf16.msra.mxu1 (!%p189_p2), %v829_v3 }
   0xd   : > { %s971_s22 = smov (!%p217_p3, %s688_s22), 31  ;;  %797 = vmatprep.subr.bf16.mxu1 %v830_v4 }
   0xe   : > { %s689_s27 = sshll.u32 %s971_s22, 2  ;;  %s691_s21 = sshll.u32 %s971_s22, 3 }
   0xf   : > { %s897_s30 = scalar_lea.vmem %s964_s0, %s689_s27  ;;  %s943_s27 = scalar_lea.vmem %s969_s5, %s691_s21 }
  0x10   : > { %v820_v5 = vld [vmem:[%s897_s30] sm:$0xff]   ;;  %v821_v6 = vld [vmem:[%s897_s30 + $0x8] sm:$0xff]   ;;  %v822_v7 = vld [vmem:[%s897_s30 + $0x10] sm:$0xff]   ;;  %805 = vmatpush3.bf16.msra.mxu1 %v830_v4 }
  0x11   : > { %747 = vmatprep.mubr.msk.bf16.mxu0 %vm293_vm1, %v820_v5  ;;  %v823_v9 = vld [vmem:[%s897_s30 + $0x18] sm:$0xff]   ;;  %798 = vmatprep.subr.bf16.mxu1 %v831_v8  ;;  %v824_v11 = vld [vmem:[%s897_s30 + $0x20] sm:$0xff]   ;;  %v825_v13 = vld [vmem:[%s897_s30 + $0x28] sm:$0xff]  }
  0x12   : > { %748 = vmatmul.mubr.msk.bf16.vlgmr.msra.gmra.mrb[0].mxu0 %vm293_vm1, %v821_v6  ;;  %v826_v14 = vld [vmem:[%s897_s30 + $0x30] sm:$0xff]   ;;  %v827_v15 = vld [vmem:[%s897_s30 + $0x38] sm:$0xff]  }
  0x13   : > { %751 = vmatprep.mubr.msk.bf16.mxu0 %vm293_vm1, %v822_v7  ;;  %764 = vmatpush3.bf16.msra.mxu0 %v828_v1 }
  0x14   : > { %765 = vmatprep.subr.bf16.mxu0 %v829_v3  ;;  %806 = vmatpush3.bf16.msra.mxu1 %v831_v8 }
  0x15   : > { %799 = vmatprep.subr.bf16.mxu1 %v832_v10 }
  0x17   : > { %766 = vmatpush3.bf16.msra.mxu0 %v829_v3 }
  0x18   : > { %767 = vmatprep.subr.bf16.mxu0 %v830_v4  ;;  %807 = vmatpush3.bf16.msra.mxu1 %v832_v10 }
  0x19   : > { %800 = vmatprep.subr.bf16.mxu1 %v833_v12 }
  0x1a   : > { %752 = vmatmul.mubr.msk.bf16.gmra.mrb[4].mxu0 %vm293_vm1, %v823_v9 }
  0x1b   : > { %755 = vmatprep.mubr.msk.bf16.mxu0 %vm293_vm1, %v824_v11  ;;  %768 = vmatpush3.bf16.msra.mxu0 %v830_v4  ;;  %v709_v11 = vld [vmem:[%s968_s4] ss:$0 sm:$0xff] }
  0x1c   : > { %769 = vmatprep.subr.bf16.mxu0 %v831_v8  ;;  %808 = vmatpush3.bf16.msra.mxu1 %v833_v12 }
  0x1d   : > { %801 = vmatprep.subr.bf16.mxu1 %v834_v16 }
  0x1f   : > { %770 = vmatpush3.bf16.msra.mxu0 %v831_v8 }
  0x20   : > { %771 = vmatprep.subr.bf16.mxu0 %v832_v10  ;;  %809 = vmatpush3.bf16.msra.mxu1 %v834_v16 }
  0x21   : > { %802 = vmatprep.subr.bf16.mxu1 %v835_v17 }
  0x22   : > { %756 = vmatmul.mubr.msk.bf16.gmra.mrb[8].mxu0 %vm293_vm1, %v825_v13 }
  0x23   : > { %759 = vmatprep.mubr.msk.bf16.mxu0 %vm293_vm1, %v826_v14  ;;  %772 = vmatpush3.bf16.msra.mxu0 %v832_v10 }
  0x24   : > { %773 = vmatprep.subr.bf16.mxu0 %v833_v12  ;;  %810 = vmatpush3.bf16.msra.mxu1 %v835_v17 }
  0x27   : > { %774 = vmatpush3.bf16.msra.mxu0 %v833_v12 }
  0x28   : > { %775 = vmatprep.subr.bf16.mxu0 %v834_v16 }
  0x2a   : > { %760 = vmatmul.mubr.msk.bf16.gmra.mrb[12].mxu0 %vm293_vm1, %v827_v15 }
  0x2b   : > { %776 = vmatpush3.bf16.msra.mxu0 %v834_v16 }
  0x2c   : > { %777 = vmatprep.subr.bf16.mxu0 %v835_v17 }
  0x2f   : > { %778 = vmatpush3.bf16.msra.mxu0 %v835_v17 }
  0xe5   : > { %v749_v19 = vpop.f32.mrb[0].mxu0 }
  0xe6   : > { %v365_v20 = vadd.f32 %v749_v19, %v692_v18  ;;  %v356_v21 = vpop.f32.mrb[1].mxu0 }
  0xe7   : > { %v357_v22 = vadd.f32 %v692_v18, %v356_v21  ;;  %v750_v23 = vpop.f32.mrb[2].mxu0 }
  0xe8   : > { %v368_v24 = vadd.f32 %v750_v23, %v692_v18  ;;  %v359_v25 = vpop.f32.mrb[3].mxu0  ;;  %v421_v27 = vmax.f32 %v365_v20, 0.0 }
  0xe9   : > { %v360_v26 = vadd.f32 %v692_v18, %v359_v25  ;;  %v419_v29 = vmax.f32 %v357_v22, 0.0 }
  0xea   : > { %v422_v28 = vmax.f32 %v368_v24, 0.0 }
  0xeb   : > { %v420_v30 = vmax.f32 %v360_v26, 0.0 }
  0xec   : > { %v453_v31 = vpack.c.bf16 %v422_v28, %v421_v27 }
  0xed   : > { %v452_v32 = vpack.c.bf16 %v420_v30, %v419_v29  ;;  %v753_v33 = vpop.f32.mrb[4].mxu0 }
  0xee   : > { %v381_v34 = vadd.f32 %v753_v33, %v692_v18  ;;  %v372_v35 = vpop.f32.mrb[5].mxu0 }
  0xef   : > { %v373_v36 = vadd.f32 %v692_v18, %v372_v35  ;;  %v754_v37 = vpop.f32.mrb[6].mxu0  ;;  %779 = vmatprep.mubr.bf16.mxu0 %v452_v32 }
  0xf0   : > { %v384_v38 = vadd.f32 %v754_v37, %v692_v18  ;;  %v375_v39 = vpop.f32.mrb[7].mxu0  ;;  %780 = vmatmul.mubr.bf16.vlgmr.msra.gmra.mrb[16].mxu0 %v453_v31  ;;  %v425_v41 = vmax.f32 %v381_v34, 0.0 }
  0xf1   : > { %v376_v40 = vadd.f32 %v692_v18, %v375_v39  ;;  %v423_v43 = vmax.f32 %v373_v36, 0.0 }
  0xf2   : > { %v426_v42 = vmax.f32 %v384_v38, 0.0 }
  0xf3   : > { %v424_v44 = vmax.f32 %v376_v40, 0.0 }
  0xf4   : > { %v455_v45 = vpack.c.bf16 %v426_v42, %v425_v41 }
  0xf5   : > { %v757_v46 = vpop.f32.mrb[8].mxu0  ;;  %v454_v47 = vpack.c.bf16 %v424_v44, %v423_v43 }
  0xf6   : > { %v397_v48 = vadd.f32 %v757_v46, %v692_v18  ;;  %v388_v49 = vpop.f32.mrb[9].mxu0 }
  0xf7   : > { %v389_v50 = vadd.f32 %v692_v18, %v388_v49  ;;  %v758_v51 = vpop.f32.mrb[10].mxu0  ;;  %783 = vmatprep.mubr.bf16.mxu1 %v454_v47 }
  0xf8   : > { %v400_v52 = vadd.f32 %v758_v51, %v692_v18  ;;  %v391_v53 = vpop.f32.mrb[11].mxu0  ;;  %784 = vmatmul.mubr.bf16.vlgmr.msra.gmra.mrb[0].mxu1 %v455_v45  ;;  %v429_v55 = vmax.f32 %v397_v48, 0.0 }
  0xf9   : > { %v392_v54 = vadd.f32 %v692_v18, %v391_v53  ;;  %v427_v57 = vmax.f32 %v389_v50, 0.0 }
  0xfa   : > { %v430_v56 = vmax.f32 %v400_v52, 0.0 }
  0xfb   : > { %v428_v58 = vmax.f32 %v392_v54, 0.0 }
  0xfc   : > { %v457_v59 = vpack.c.bf16 %v430_v56, %v429_v55 }
  0xfd   : > { %v456_v60 = vpack.c.bf16 %v428_v58, %v427_v57  ;;  %v761_v61 = vpop.f32.mrb[12].mxu0 }
  0xfe   : > { %v413_v62 = vadd.f32 %v761_v61, %v692_v18  ;;  %v404_v63 = vpop.f32.mrb[13].mxu0 }
  0xff   : > { %v405_v0 = vadd.f32 %v692_v18, %v404_v63  ;;  %v762_v1 = vpop.f32.mrb[14].mxu0  ;;  %787 = vmatprep.mubr.bf16.mxu1 %v456_v60 }
 0x100   : > { %v416_v2 = vadd.f32 %v762_v1, %v692_v18  ;;  %v407_v3 = vpop.f32.mrb[15].mxu0  ;;  %788 = vmatmul.mubr.bf16.gmra.mrb[4].mxu1 %v457_v59  ;;  %v433_v5 = vmax.f32 %v413_v62, 0.0 }
 0x101   : > { %v408_v4 = vadd.f32 %v692_v18, %v407_v3  ;;  %v431_v7 = vmax.f32 %v405_v0, 0.0 }
 0x102   : > { %v434_v6 = vmax.f32 %v416_v2, 0.0 }
 0x103   : > { %v432_v8 = vmax.f32 %v408_v4, 0.0 }
 0x104   : > { %v459_v9 = vpack.c.bf16 %v434_v6, %v433_v5 }
 0x105   : > { %v458_v10 = vpack.c.bf16 %v432_v8, %v431_v7 }
 0x107   : > { %791 = vmatprep.mubr.bf16.mxu1 %v458_v10 }
 0x108   : > { %792 = vmatmul.mubr.bf16.gmra.mrb[8].mxu1 %v459_v9 }
 0x1c3   : > { %v781_v12 = vpop.f32.mrb[16].mxu0 }
 0x1c4   : > { %v557_v13 = vadd.f32 %v781_v12, %v709_v11  ;;  %v548_v14 = vpop.f32.mrb[17].mxu0 }
 0x1c5   : > { %v549_v15 = vadd.f32 %v709_v11, %v548_v14  ;;  %v782_v16 = vpop.f32.mrb[18].mxu0 }
 0x1c6   : > { %613 = vst [vmem:[%s943_s27 + $0x10] sm:$0xff] %v557_v13  ;;  %v560_v17 = vadd.f32 %v782_v16, %v709_v11  ;;  %v551_v18 = vpop.f32.mrb[19].mxu0 }
 0x1c7   : > { %611 = vst [vmem:[%s943_s27] sm:$0xff] %v549_v15  ;;  %v552_v19 = vadd.f32 %v709_v11, %v551_v18 }
 0x1c8   : > { %614 = vst [vmem:[%s943_s27 + $0x18] sm:$0xff] %v560_v17 }
 0x1c9   : > { %612 = vst [vmem:[%s943_s27 + $0x8] sm:$0xff] %v552_v19 }
 0x1cb   : > { %v785_v20 = vpop.f32.mrb[0].mxu1 }
 0x1cc   : > { %v573_v21 = vadd.f32 %v785_v20, %v709_v11  ;;  %v564_v22 = vpop.f32.mrb[1].mxu1 }
 0x1cd   : > { %v565_v23 = vadd.f32 %v709_v11, %v564_v22  ;;  %v786_v24 = vpop.f32.mrb[2].mxu1 }
 0x1ce   : > { %617 = vst [vmem:[%s943_s27 + $0x30] sm:$0xff] %v573_v21  ;;  %v576_v25 = vadd.f32 %v786_v24, %v709_v11  ;;  %v567_v26 = vpop.f32.mrb[3].mxu1 }
 0x1cf   : > { %615 = vst [vmem:[%s943_s27 + $0x20] sm:$0xff] %v565_v23  ;;  %v568_v27 = vadd.f32 %v709_v11, %v567_v26 }
 0x1d0   : > { %618 = vst [vmem:[%s943_s27 + $0x38] sm:$0xff] %v576_v25 }
 0x1d1   : > { %616 = vst [vmem:[%s943_s27 + $0x28] sm:$0xff] %v568_v27 }
 0x1d3   : > { %v789_v28 = vpop.f32.mrb[4].mxu1 }
 0x1d4   : > { %v589_v29 = vadd.f32 %v789_v28, %v709_v11  ;;  %v580_v30 = vpop.f32.mrb[5].mxu1 }
 0x1d5   : > { %v581_v31 = vadd.f32 %v709_v11, %v580_v30  ;;  %v790_v32 = vpop.f32.mrb[6].mxu1 }
 0x1d6   : > { %621 = vst [vmem:[%s943_s27 + $0x50] sm:$0xff] %v589_v29  ;;  %v592_v33 = vadd.f32 %v790_v32, %v709_v11  ;;  %v583_v34 = vpop.f32.mrb[7].mxu1 }
 0x1d7   : > { %619 = vst [vmem:[%s943_s27 + $0x40] sm:$0xff] %v581_v31  ;;  %v584_v35 = vadd.f32 %v709_v11, %v583_v34 }
 0x1d8   : > { %622 = vst [vmem:[%s943_s27 + $0x58] sm:$0xff] %v592_v33 }
 0x1d9   : > { %620 = vst [vmem:[%s943_s27 + $0x48] sm:$0xff] %v584_v35 }
 0x1db   : > { %v793_v36 = vpop.f32.mrb[8].mxu1 }
 0x1dc   : > { %v605_v37 = vadd.f32 %v793_v36, %v709_v11  ;;  %v596_v38 = vpop.f32.mrb[9].mxu1 }
 0x1dd   : > { %v597_v39 = vadd.f32 %v709_v11, %v596_v38  ;;  %v794_v40 = vpop.f32.mrb[10].mxu1 }
 0x1de   : > { %625 = vst [vmem:[%s943_s27 + $0x70] sm:$0xff] %v605_v37  ;;  %v608_v41 = vadd.f32 %v794_v40, %v709_v11  ;;  %v599_v42 = vpop.f32.mrb[11].mxu1 }
 0x1df   : > { %623 = vst [vmem:[%s943_s27 + $0x60] sm:$0xff] %v597_v39  ;;  %v600_v43 = vadd.f32 %v709_v11, %v599_v42 }
 0x1e0   : > { %626 = vst [vmem:[%s943_s27 + $0x78] sm:$0xff] %v608_v41 }
 0x1e1   : > { %624 = vst [vmem:[%s943_s27 + $0x68] sm:$0xff] %v600_v43 }
 0x1e2 PF: > { %s15_s18 = sadd.s32 1, %s842_s18  }
 0x1e3   : > { %p12_p4 = scmp.ge.s32.totalorder %s15_s18, 4  }
 0x1e5   :  { %14 = sbr.rel (!%p12_p4) target bundleno = 1 (0x1), region = 70 }

</bundles_post_ra>
